<compile_context>
chip_gen: v6e
topology: v6e:2x2x1
jax: 0.10.0
libtpu: 0.0.40
codegen_flags: <defaults>
</compile_context>

<pallas_src>
import jax
import jax.numpy as jnp
import numpy as np
from jax.experimental import pallas as pl
from jax.experimental.pallas import tpu as pltpu

# In-flight VMEM budget for the double-buffered x-in + x-out streams.
# 16 MiB streamed tiles + 32 MiB scoped limit leaves 2x headroom on every
# generation (v5e/v6e physical 128 MiB, v7x physical 64 MiB per TensorCore).
_WS_BYTES = 16 * 1024 * 1024
_VMEM_LIMIT_BYTES = 32 * 1024 * 1024


def _fma_nchw_kernel(x_ref, p_ref, o_ref):
    # x_ref/o_ref: (1, tc, tl);  p_ref: (2, tc, 1) float32 = (scale, shift).
    p = p_ref[...]
    y = x_ref[...] * p[0:1] + p[1:2]           # broadcast over lanes (VPU FMA)
    o_ref[...] = y.astype(o_ref.dtype)


def _fma_flat_kernel(x_ref, p_ref, o_ref):
    # x_ref/o_ref: (1, 1, tf);  p_ref: (2, tf) float32 = (scale row, shift row).
    p = p_ref[...]
    y = x_ref[...] * p[0:1, :] + p[1:2, :]     # (1,1,tf) * (1,tf) -> (1,1,tf)
    o_ref[...] = y.astype(o_ref.dtype)


def _pick_tiles_nchw(N, C, L, itemsize):
    """Channel/lane tiles for the (N, C, L) layout, sized from _WS_BYTES."""
    budget = max(1, _WS_BYTES // (4 * itemsize))        # elements per x block
    sub = max(8, 32 // itemsize)                        # sublane pack 8/16/32
    if C * L <= budget:
        tc, tl = C, L                                   # whole sample per block
    elif sub * L <= budget:
        tl = L                                          # full rows: no ragged lane tail
        tc = max(sub, (budget // L) // sub * sub)       # multiple of sub, < C
    else:
        tc = C if C <= sub else sub
        tl = min(L, max(128, (budget // tc) // 128 * 128))
    # Keep >= 2 grid blocks so both v7x TensorCores get work (no-op v5e/v6e).
    if N * pl.cdiv(C, tc) * pl.cdiv(L, tl) < 2:
        if tl % 256 == 0:
            tl //= 2
        elif tc >= 2 * sub:
            half = -(-tc // 2)
            tc = -(-half // sub) * sub
    return tc, tl


def _pick_tile_flat(N, F, itemsize):
    """Lane tile for the flattened (N, 1, C*L) layout (params counted in budget)."""
    # Bytes in flight per lane: 2x in + 2x out (itemsize each) + 2x f32 param rows.
    budget = max(128, _WS_BYTES // (4 * itemsize + 16))
    tf = F if F <= budget else (budget // 128) * 128
    if N * pl.cdiv(F, tf) < 2:
        if tf % 256 == 0:
            tf //= 2
        elif tf > 256:
            half = -(-tf // 2)
            tf = -(-half // 128) * 128
    return tf


def frozen_batchnorm2d(x, weight, bias, running_mean, running_var, eps=1e-5):
    """Pallas TPU implementation of FrozenBatchNorm2d.forward (NCHW input)."""
    N, C, H, W = x.shape
    L = H * W
    itemsize = jnp.dtype(x.dtype).itemsize

    # Fold the frozen statistics into per-channel scale/shift once, in float32
    # (matches the fp32 buffer math of the PyTorch module).
    w32 = weight.astype(jnp.float32)
    b32 = bias.astype(jnp.float32)
    rm32 = running_mean.astype(jnp.float32)
    rv32 = running_var.astype(jnp.float32)
    scale = w32 * jax.lax.rsqrt(rv32 + jnp.float32(eps))
    shift = b32 - rm32 * scale

    flops = 2 * N * C * L
    x_bytes = x.size * itemsize

    if L % 128 == 0:
        # Lane-aligned spatial size: zero-copy (N, C, H*W) view, channel axis on
        # sublanes, spatial axis lane-dense -> every store is an unmasked vst.
        tc, tl = _pick_tiles_nchw(N, C, L, itemsize)
        x3 = x.reshape(N, C, L)
        params = jnp.stack([scale, shift], axis=0).reshape(2, C, 1)

        grid = (N, pl.cdiv(C, tc), pl.cdiv(L, tl))
        x_spec = pl.BlockSpec((1, tc, tl), lambda n, c, l: (n, c, l))
        p_spec = pl.BlockSpec((2, tc, 1), lambda n, c, l: (0, c, 0))

        out3 = pl.pallas_call(
            _fma_nchw_kernel,
            out_shape=jax.ShapeDtypeStruct((N, C, L), x.dtype),
            grid=grid,
            in_specs=[x_spec, p_spec],
            out_specs=x_spec,
            compiler_params=pltpu.CompilerParams(
                dimension_semantics=("parallel", "parallel", "parallel"),
                vmem_limit_bytes=_VMEM_LIMIT_BYTES),
            cost_estimate=pl.CostEstimate(
                flops=flops, transcendentals=0,
                bytes_accessed=2 * x_bytes + params.size * 4),
        )(x3, params)
        return out3.reshape(N, C, H, W)

    # H*W not a multiple of 128 (e.g. 49/196/784/3136): flatten each sample's
    # contiguous (C, H*W) into one lane-dense row so stores stay unmasked, and
    # pre-expand scale/shift to per-position rows.  N is the innermost grid
    # axis so the expanded params are DMA'd once per lane block, not per sample.
    F = C * L
    tf = _pick_tile_flat(N, F, itemsize)
    x3 = x.reshape(N, 1, F)
    params = jnp.stack([jnp.repeat(scale, L), jnp.repeat(shift, L)], axis=0)  # (2, F) f32

    grid = (pl.cdiv(F, tf), N)
    x_spec = pl.BlockSpec((1, 1, tf), lambda l, n: (n, 0, l))
    p_spec = pl.BlockSpec((2, tf), lambda l, n: (0, l))

    out3 = pl.pallas_call(
        _fma_flat_kernel,
        out_shape=jax.ShapeDtypeStruct((N, 1, F), x.dtype),
        grid=grid,
        in_specs=[x_spec, p_spec],
        out_specs=x_spec,
        compiler_params=pltpu.CompilerParams(
            dimension_semantics=("parallel", "parallel"),
            vmem_limit_bytes=_VMEM_LIMIT_BYTES),
        cost_estimate=pl.CostEstimate(
            flops=flops, transcendentals=0,
            bytes_accessed=2 * x_bytes + params.size * 4),
    )(x3, params)
    return out3.reshape(N, C, H, W)


def _reference(x, weight, bias, running_mean, running_var, eps):
    C = x.shape[1]
    w_ = weight.reshape(1, C, 1, 1)
    b_ = bias.reshape(1, C, 1, 1)
    rv_ = running_var.reshape(1, C, 1, 1)
    rm_ = running_mean.reshape(1, C, 1, 1)
    s = w_ * jax.lax.rsqrt(rv_ + eps)
    return x * s + (b_ - rm_ * s)


if __name__ == "__main__":
    key = jax.random.PRNGKey(0)
    eps = 1e-5

    # Primary small shape + a 7x7 tail exercising the lane-dense flat path
    # (H*W = 49 is not a multiple of 128).
    for shape in [(2, 4, 16, 16), (2, 8, 7, 7)]:
        key, kx, kw, kb, km, kv = jax.random.split(key, 6)
        N, C, H, W = shape
        x = jax.random.normal(kx, shape, dtype=jnp.float32)
        weight = jnp.ones((C,), jnp.float32) + 0.1 * jax.random.normal(kw, (C,))
        bias = 0.1 * jax.random.normal(kb, (C,))
        running_mean = 0.1 * jax.random.normal(km, (C,))
        running_var = jnp.ones((C,), jnp.float32) + 0.05 * jax.random.uniform(kv, (C,))

        out = frozen_batchnorm2d(x, weight, bias, running_mean, running_var, eps)
        out = jax.block_until_ready(out)
        ref = _reference(x, weight, bias, running_mean, running_var, eps)
        np.testing.assert_allclose(np.asarray(out), np.asarray(ref),
                                   rtol=1e-5, atol=1e-5)

    print("KERNEL_OK")
</pallas_src>

<mosaic_0001>
module attributes {stable_mosaic.version = 11 : i64} {
  func.func @_fma_nchw_kernel(%arg0: i32, %arg1: i32, %arg2: i32, %arg3: memref<1x4x256xf32, #tpu.memory_space<vmem>>, %arg4: memref<2x4x1xf32, #tpu.memory_space<vmem>>, %arg5: memref<1x4x256xf32, #tpu.memory_space<vmem>>) attributes {dimension_semantics = [#tpu.dimension_semantics<parallel>, #tpu.dimension_semantics<parallel>, #tpu.dimension_semantics<parallel>], iteration_bounds = array<i64: 2, 1, 1>, scalar_prefetch = 0 : i64, scratch_operands = 0 : i64, tpu.core_type = #tpu.core_type<tc>, window_params = [{transform_indices = @transform_0, window_bounds = array<i64: 1, 4, 256>}, {transform_indices = @transform_1, window_bounds = array<i64: 2, 4, 1>}, {transform_indices = @transform_2, window_bounds = array<i64: 1, 4, 256>}]} {
    %c0 = arith.constant 0 : index
    %c0_0 = arith.constant 0 : index
    %c0_1 = arith.constant 0 : index
    %0 = vector.load %arg4[%c0, %c0_0, %c0_1] : memref<2x4x1xf32, #tpu.memory_space<vmem>>, vector<2x4x1xf32>
    %c0_2 = arith.constant 0 : index
    %c0_3 = arith.constant 0 : index
    %c0_4 = arith.constant 0 : index
    %1 = vector.load %arg3[%c0_2, %c0_3, %c0_4] : memref<1x4x256xf32, #tpu.memory_space<vmem>>, vector<1x4x256xf32>
    %2 = vector.extract_strided_slice %0 {offsets = [0, 0, 0], sizes = [1, 4, 1], strides = [1, 1, 1]} : vector<2x4x1xf32> to vector<1x4x1xf32>
    %3 = vector.broadcast %2 : vector<1x4x1xf32> to vector<1x4x256xf32>
    %4 = arith.mulf %1, %3 : vector<1x4x256xf32>
    %5 = vector.extract_strided_slice %0 {offsets = [1, 0, 0], sizes = [1, 4, 1], strides = [1, 1, 1]} : vector<2x4x1xf32> to vector<1x4x1xf32>
    %6 = vector.broadcast %5 : vector<1x4x1xf32> to vector<1x4x256xf32>
    %7 = arith.addf %4, %6 : vector<1x4x256xf32>
    %c0_5 = arith.constant 0 : index
    %c0_6 = arith.constant 0 : index
    %c0_7 = arith.constant 0 : index
    %8 = vector.load %arg5[%c0_5, %c0_6, %c0_7] : memref<1x4x256xf32, #tpu.memory_space<vmem>>, vector<1x4x256xf32>
    tpu.vector_store %arg5[%c0_5, %c0_6, %c0_7], %7 {strides = array<i32>} : memref<1x4x256xf32, #tpu.memory_space<vmem>>, vector<1x4x256xf32>,
    return
  }
  func.func @transform_0(%arg0: i32, %arg1: i32, %arg2: i32) -> (i32, i32, i32) {
    %c0_i32 = arith.constant 0 : i32
    return %arg0, %arg1, %arg2 : i32, i32, i32
  }
  func.func @transform_1(%arg0: i32, %arg1: i32, %arg2: i32) -> (i32, i32, i32) {
    %c0_i32 = arith.constant 0 : i32
    %c0_i32_0 = arith.constant 0 : i32
    %c0_i32_1 = arith.constant 0 : i32
    return %c0_i32, %arg1, %c0_i32_0 : i32, i32, i32
  }
  func.func @transform_2(%arg0: i32, %arg1: i32, %arg2: i32) -> (i32, i32, i32) {
    %c0_i32 = arith.constant 0 : i32
    return %arg0, %arg1, %arg2 : i32, i32, i32
  }
}

</mosaic_0001>

<bundles_post_ra>
// kernel: tpu_custom_call.1
= control target key start
LH: loop header
LB: loop body
LE: loop exit
PB: predicated region body
PF: predicated region fallthrough
CT: control target
= control target key end

     0   :  { %7 = vsyncpa [#allocation3], 0  ;;  %s717_s0 = inlined_call_operand.hbm [shape: f32[2,4,256], index: 0, kind: input, shape index: {}]   ;;  %s718_s1 = inlined_call_operand.vmem [shape: f32[2,4,1], index: 1, kind: input, shape index: {}]   ;;  %s719_s2 = inlined_call_operand.hbm [shape: f32[2,4,256], index: 2, kind: output, shape index: {}]  }
   0x1   :  { %9 = vsyncpa [#allocation3 + $0x1], 0 }
   0x2   :  { %10 = vsyncpa [#allocation4], 0 }
   0x3   :  { %12 = vsyncpa [#allocation4 + $0x1], 0  ;;  %s577_s9 = smov 0   ;;  %s579_s10 = smov 0  }
   0x4   :  { %s581_s11 = smov 0   ;;  %s583_s12 = smov 0  }
   0x5   :  { %s585_s13 = smov 0   ;;  %s587_s14 = smov 0  }
   0x6 LB: > { %s365_s15 = sadd.s32 4294967295, %s556_s14   ;;  %s366_s16 = sadd.s32 4294967294, %s556_s14   ;;  %s556_s14 = sphi %s587_s14, %s18_s14   ;;  %s552_s13 = sphi %s585_s13, %s731_s13   ;;  %s548_s12 = sphi %s583_s12, %s730_s12   ;;  %s544_s11 = sphi %s581_s11, %s729_s11   ;;  %s540_s10 = sphi %s579_s10, %s728_s10   ;;  %s536_s9 = sphi %s577_s9, %s727_s9  }
   0x7   : > { %s37_s17 = sadd.s32 1, %s552_s13  ;;  %s48_s18 = sadd.s32 1, %s544_s11 }
   0x8   : > { %p39_p0 = scmp.ge.s32.totalorder %s37_s17, 2  ;;  %p55_p1 = scmp.ne.s32.totalorder %s544_s11, %s540_s10 }
   0x9   : > { %p56_p2 = scmp.eq.s32.totalorder %s556_s14, 0  ;;  %p61_p3 = scmp.ne.s32.totalorder %s540_s10, %s536_s9 }
   0xa   : > { %s733_s17 = smov (%p39_p0, %s37_s17), 0  ;;  %p62_p5 = scmp.eq.s32.totalorder %s365_s15, 0 }
   0xb   : > { %p618_p4 = por %p56_p2, %p55_p1  ;;  %s41_s20 = ssub.s32 %s552_s13, %s733_s17 }
   0xc   : > { %p115_p6 = scmp.eq.s32.totalorder %s365_s15, 1  ;;  %p46_p7 = scmp.eq.s32.totalorder %s41_s20, 0 }
   0xd   : > { %p624_p8 = por %p62_p5, %p61_p3  ;;  %p121_p10 = scmp.eq.s32.totalorder %s366_s16, 1 }
   0xe   : > { %p628_p9 = por %p115_p6, %p55_p1  ;;  %p395_p13 = scmp.lt.s32.totalorder %s556_s14, 2 }
   0xf   : > { %s633_s23 = scalar_select %p46_p7, %s544_s11, %s48_s18  }
  0x10   : > { %p635_p11 = por %p121_p10, %p61_p3  ;;  %s148_s25 = sand.u32 1, %s544_s11  }
  0x11   : > { %s370_s26 = sshll.u32 %s148_s25, 3  ;;  %s381_s27 = sshll.u32 %s552_s13, 7 }
  0x12   : > { %s723_s24 = scalar_select %p635_p11, 1, 0 }
  0x13   : > { %s162_s30 = scalar_lea.hbm %s717_s0, %s381_s27  ;;  %s152_s3 = scalar_lea.vmem [#allocation2], %s370_s26 }
  0x14   : > { %s164_s4 = sshll.u32 %s152_s3, 4  ;;  %p648_p0 = pnand %p395_p13, %p618_p4  ;;  %s165_s4 = int_to_ptr.vmem [resolvable:$true] %s164_s4 }
  0x15   : > { %p373_p1 = scmp.ge.s32.totalorder %s556_s14, 1  ;;  %p169_p2 = scmp.lt.s32.totalorder %s556_s14, 3 }
  0x16   : > { %s149_s6 = scalar_lea.sflag [#allocation3], %s148_s25  ;;  %p450_p3 = pneg %p648_p0 }
  0x17   : > { %s461_s7 = scalar_lea.vmem %s165_s4, 128  ;;  %s558_s8 = smov [#allocation2]  }
  0x18   : > { %p462_p5 = scmp.ne.s32.totalorder %s165_s4, %s461_s7  ;;  %s466_s15 = sshll.u32 %s558_s8, 4  ;;  %s467_s15 = int_to_ptr.vmem [resolvable:$false] %s466_s15 }
  0x19   : > { %s468_s16 = scalar_lea.vmem %s467_s15, 256  ;;  %p469_p10 = scmp.lt.s32.totalorder %s165_s4, %s467_s15 }
  0x1a   : > { %p464_p6 = pnand %p462_p5, %p450_p3  ;;  %p470_p12 = scmp.lt.s32.totalorder %s468_s16, %s461_s7 }
  0x1c   : > { %p465_p7 = pneg %p464_p6  ;;  %p471_p4 = por %p470_p12, %p469_p10 }
  0x1e   : > { %p472_p13 = pnand %p471_p4, %p465_p7 }
  0x20   : > { %475 = shalt.err (!%p472_p13)
}
  0x21   : > { %390 = dma.hbm_to_vmem [thread:$0]  (!%p648_p0), %s162_s30, 128, %s165_s4, %s149_s6  }
  0x22   : > { %p170_p11 = pnand %p373_p1, %p169_p2 }
  0x23   : > { %s663_s18 = sand.u32 (!%p170_p11), 1, %s540_s10  }
  0x24   : > { %173 = sbr.rel (%p170_p11) target bundleno = 189 (0xbd), region = 28  ;;  %s374_s19 = sshll.u32 (!%p170_p11), %s663_s18, 3 }
  0x25   : > { %s176_s20 = scalar_lea.sflag (!%p170_p11), [#allocation3], %s663_s18  ;;  %s179_s25 = scalar_lea.vmem (!%p170_p11), [#allocation2], %s374_s19 }
  0x29   : > { %527 = dma.done.wait (%p624_p8), %s176_s20, 128  }
  0x2a   : > { %529 = vsyncadd (%p624_p8), %s176_s20, 4294967168  ;;  %v559_v0 = vmov 0   ;;  %v210_v1 = vld [vmem:[%s718_s1] sm:$0xf]  ;;  %v211_v2 = vld [vmem:[%s718_s1 + $0x4] sm:$0xf]  ;;  %v220_v5 = vlaneseq }
  0x2b   : > { %447 = vset.pattern.permute.xlu0 %v559_v0  ;;  %v560_v3 = vmov 839922192   ;;  %v212_v11 = vld [vmem:[%s179_s25] sm:$0xff]  ;;  %s382_s21 = sshll.u32 %s548_s12, 7  ;;  %s203_s30 = scalar_lea.vmem [#allocation5], %s374_s19 }
  0x2c   : > { %215 = vperm.xlu0 %447, %v210_v1   ;;  %v218_v4 = vunpack.c.l.s4 %v560_v3  ;;  %v221_v7 = vshrl.u32 %v220_v5, 7  ;;  %s259_s3 = sshll.u32 %s203_s30, 4  ;;  %s257_s6 = scalar_lea.hbm %s719_s2, %s382_s21  ;;  %s260_s3 = int_to_ptr.vmem [resolvable:$true] %s259_s3 }
  0x2d   : > { %s241_s7 = scalar_lea.sflag [#allocation4], %s663_s18  ;;  %s476_s8 = scalar_lea.vmem %s260_s3, 128 }
  0x2e   : > { %v219_v6 = vunpack.c.0.s8 %v218_v4  ;;  %p477_p8 = scmp.ne.s32.totalorder %s260_s3, %s476_s8  ;;  %s561_s15 = smov [#allocation5]  }
  0x2f   : > { %s480_s16 = sshll.u32 %s561_s15, 4  ;;  %s481_s16 = int_to_ptr.vmem [resolvable:$false] %s480_s16 }
  0x30   : > { %228 = vperm.xlu0 %447, %v211_v2   ;;  %v222_v8 = vsub.s32 %v219_v6, %v221_v7  ;;  %p478_p11 = pnand %p477_p8, %p628_p9  ;;  %s482_s12 = scalar_lea.vmem %s481_s16, 256 }
  0x31   : > { %p483_p0 = scmp.lt.s32.totalorder %s260_s3, %s481_s16  ;;  %p484_p1 = scmp.lt.s32.totalorder %s482_s12, %s476_s8 }
  0x32   : > { %p479_p12 = pneg %p478_p11 }
  0x33   : > { %p485_p2 = por %p484_p1, %p483_p0 }
  0x35   : > { %p486_p3 = pnand %p485_p2, %p479_p12 }
  0xa7   : > { %v216_v9 = vpop.permute.xlu0 %215 }
  0xa8   : > { %v223_v10 = vrot.slane %v216_v9, %v222_v8 }
  0xaa   : > { %v225_v13 = vmul.f32 %v223_v10, %v212_v11 }
  0xab   : > { %v229_v12 = vpop.permute.xlu0 %228 }
  0xac   : > { %v236_v14 = vrot.slane %v229_v12, %v222_v8 }
  0xae   : > { %v238_v15 = vadd.f32 %v236_v14, %v225_v13 }
  0xb0   : > { %239 = vst [vmem:[%s203_s30] sm:$0xff] %v238_v15 }
  0xb1   : > { %489 = shalt.err (!%p486_p3)
}
  0xb2   : > { %s490_s19 = scalar_lea.hbm %s257_s6, 128  ;;  %s494_s25 = scalar_lea.hbm %s719_s2, 256 }
  0xb3   : > { %p491_p5 = scmp.ne.s32.totalorder %s257_s6, %s490_s19  ;;  %p495_p10 = scmp.lt.s32.totalorder %s257_s6, %s719_s2 }
  0xb4   : > { %p496_p4 = scmp.lt.s32.totalorder %s494_s25, %s490_s19 }
  0xb5   : > { %p492_p6 = pnand %p491_p5, %p628_p9 }
  0xb6   : > { %p497_p13 = por %p496_p4, %p495_p10 }
  0xb7   : > { %p493_p7 = pneg %p492_p6 }
  0xb9   : > { %p498_p8 = pnand %p497_p13, %p493_p7 }
  0xbb   : > { %501 = shalt.err (!%p498_p8)
}
  0xbc   : > { %385 = dma.vmem_to_hbm [thread:$0]  (%p628_p9), %s260_s3, 128, %s257_s6, %s241_s7  }
  0xbd PF: > { %s271_s28 = sand.u32 1, %s536_s9   ;;  %p725_p11 = scmp.ne.s32.totalorder %s723_s24, 0 }
  0xbe   : > { %p726_p12 = scmp.ge.s32.totalorder %s556_s14, 2  ;;  %s272_s29 = scalar_lea.sflag [#allocation4], %s271_s28 }
  0xc0   : > { %p392_p0 = pnand %p726_p12, %p725_p11 }
  0xc2   : > { %p393_p1 = pneg %p392_p0 }
  0xc4   : > { %531 = dma.done.wait (%p393_p1), %s272_s29, 128  }
  0xc5   : > { %533 = vsyncadd (%p393_p1), %s272_s29, 4294967168  ;;  %s18_s14 = sadd.s32 1, %s556_s14   ;;  %s727_s9 = smov %s540_s10 }
  0xc6   : > { %p15_p2 = scmp.ge.s32.totalorder %s18_s14, 4   ;;  %s728_s10 = smov %s544_s11 }
  0xc7   : > { %s729_s11 = smov %s633_s23  ;;  %s730_s12 = smov %s552_s13 }
  0xc8   : > { %s731_s13 = smov %s733_s17  ;;  %17 = sbr.rel (!%p15_p2) target bundleno = 6 (0x6), region = 76 }
  0xcd   :  { %277 = vsyncpa [#allocation3], 1 }
  0xce   :  { %279 = vsyncpa [#allocation3 + $0x1], 1 }
  0xcf   :  { %280 = vsyncpa [#allocation4], 1 }
  0xd0   :  { %282 = vsyncpa [#allocation4 + $0x1], 1 }

</bundles_post_ra>
